<compile_context>
chip_gen: v5e
topology: v5e:2x2
jax: 0.10.0
libtpu: 0.0.40
codegen_flags: <defaults>
</compile_context>

<pallas_src>
import functools
import math

import jax
import jax.numpy as jnp
from jax.experimental import pallas as pl
from jax.experimental.pallas import tpu as pltpu

# ---- model constants (mirror the PyTorch module) ---------------------------
HIDDEN = 64
LOG_STD_MIN = -20.0
LOG_STD_MAX = 2.0
ACTION_MAX = 1.0
ACTION_MIN = -1.0
ACTION_SCALE = (ACTION_MAX - ACTION_MIN) / 2.0   # 1.0
ACTION_BIAS = (ACTION_MAX + ACTION_MIN) / 2.0    # 0.0
LEAKY_SLOPE = 0.01                               # F.leaky_relu default
LOG_SQRT_2PI = 0.5 * math.log(2.0 * math.pi)

# ---- padded (hardware-tile) dims -------------------------------------------
S_PAD = 128                       # padded state dim fed to the first matmul
H_PAD = 128                       # padded hidden dim
A_HALF = 64                       # padded per-head (mean / log_std) dim
W_COLS = 2 * H_PAD + 2 * A_HALF   # 384 : [W1 | W2 | Wmean | Wlogstd] along lanes
OUT_W = 2 * A_HALF                # 128 : [action | log_prob] output slab

TB_MAX = 1024                     # max batch tile (rows) per grid step
MIN_SPLIT_B = 128                 # below this, keep a single grid program


def _round_up(x, m):
    return ((x + m - 1) // m) * m


def _choose_tiles(batch):
    """Pick (tile_rows, padded_batch). Moderate/large batches get >=2 programs
    so both v7x TensorCores are used; tiles are capped at TB_MAX."""
    b_min = max(_round_up(batch, 8), 8)
    if b_min < MIN_SPLIT_B:
        return b_min, b_min
    n_prog = max(2, -(-b_min // TB_MAX))
    tb = _round_up(-(-b_min // n_prog), 8)
    return tb, tb * n_prog


def _leaky_relu(x):
    return jnp.where(x >= 0, x, LEAKY_SLOPE * x)


def actor_kernel(state_ref, noise_ref, w_ref, b_ref, out_ref, x_scr, eps_scr,
                 *, s_real, a_real):
    mm_dtype = w_ref.dtype   # bf16 slab -> bf16 MXU operands, f32 accumulation

    # ---- pad narrow inputs to lane-dense tiles inside VMEM ------------------
    # Zero every step (cheap VMEM stores; safe when the grid is sharded across
    # cores), then fill only the real lanes from the streamed (tb, S)/(tb, A)
    # blocks. Padded lanes stay exactly 0 -> mean = log_std = eps = 0 there.
    x_scr[...] = jnp.zeros_like(x_scr)
    eps_scr[...] = jnp.zeros_like(eps_scr)
    x_scr[:, :s_real] = state_ref[...]
    eps_scr[:, :a_real] = noise_ref[...]
    x = x_scr[...]                                   # (tb, 128) f32
    eps = eps_scr[...]                               # (tb, 64)  f32

    # ---- static, lane-aligned slices of the packed parameter slabs ----------
    w1 = w_ref[:, 0:H_PAD]                           # (128, 128)
    w2 = w_ref[:, H_PAD:2 * H_PAD]                   # (128, 128)
    wh = w_ref[:, 2 * H_PAD:W_COLS]                  # (128, 128) fused mean|log_std
    b1 = b_ref[:, 0:H_PAD]
    b2 = b_ref[:, H_PAD:2 * H_PAD]
    bh = b_ref[:, 2 * H_PAD:W_COLS]

    # ---- MLP trunk (bf16 MXU operands, f32 accumulation, f32 epilogue) ------
    h = jnp.dot(x.astype(mm_dtype), w1, preferred_element_type=jnp.float32) + b1
    h = _leaky_relu(h)
    h = jnp.dot(h.astype(mm_dtype), w2, preferred_element_type=jnp.float32) + b2
    h = _leaky_relu(h)

    # fused mean / log_std head: single MXU push, 128-lane output
    heads = jnp.dot(h.astype(mm_dtype), wh, preferred_element_type=jnp.float32) + bh
    mean = heads[:, :A_HALF]                         # (tb, 64)
    log_std = jnp.clip(heads[:, A_HALF:], LOG_STD_MIN, LOG_STD_MAX)

    # ---- rsample + tanh squash ----------------------------------------------
    std = jnp.exp(log_std)
    sample = mean + std * eps
    x_t = jnp.tanh(sample)
    action = ACTION_SCALE * x_t + ACTION_BIAS
    # NOTE: the PyTorch code calls torch.clip(action, max, min) with swapped
    # arguments (min=1, max=-1), which clamps everything to -1. Reproduce that
    # exact semantics (apply the min bound, then the max bound).
    action = jnp.minimum(jnp.maximum(action, ACTION_MAX), ACTION_MIN)

    # Normal(mean, std).log_prob(sample) with sample = mean + std*eps:
    #   -((sample-mean)^2)/(2*var) - log_std - 0.5*log(2*pi) == -0.5*eps^2 - ...
    log_prob = -0.5 * (eps * eps) - log_std - LOG_SQRT_2PI

    # tanh-squash correction: unmasked lane-sum minus the compile-time
    # contribution of the padded lanes (each padded lane has x_t == 0 exactly,
    # so it contributes exactly log(1 + 1e-6)).
    corr = jnp.log(ACTION_SCALE * (1.0 - x_t * x_t) + 1e-6)
    corr_sum = (jnp.sum(corr, axis=-1, keepdims=True)
                - (A_HALF - a_real) * math.log(1.0 + 1e-6))
    log_prob = log_prob - corr_sum                   # broadcast (tb, 64)

    # single lane-dense (tb, 128) output slab: [action | log_prob]
    out_ref[...] = jnp.concatenate([action, log_prob], axis=-1).astype(out_ref.dtype)


def pack_params(params, matmul_dtype=jnp.bfloat16):
    """Pack all weights into one (128, 384) slab and all biases into one
    (1, 384) slab. Call ONCE per parameter update (hoisted out of the forward
    path). Padded rows/columns are exactly zero (the kernel relies on this)."""
    f32 = jnp.float32

    def pad2(w, rows, cols):
        w = jnp.asarray(w, f32)
        return jnp.zeros((rows, cols), f32).at[:w.shape[0], :w.shape[1]].set(w)

    S = int(jnp.asarray(params["w1"]).shape[0])
    A = int(jnp.asarray(params["wm"]).shape[1])
    assert S <= S_PAD and A <= A_HALF and HIDDEN <= H_PAD, "dims exceed padded tiles"

    w_slab = jnp.concatenate(
        [pad2(params["w1"], S_PAD, H_PAD),
         pad2(params["w2"], H_PAD, H_PAD),
         pad2(params["wm"], H_PAD, A_HALF),
         pad2(params["ws"], H_PAD, A_HALF)], axis=1).astype(matmul_dtype)  # (128,384)
    b_slab = jnp.concatenate(
        [pad2(jnp.reshape(params["b1"], (1, -1)), 1, H_PAD),
         pad2(jnp.reshape(params["b2"], (1, -1)), 1, H_PAD),
         pad2(jnp.reshape(params["bm"], (1, -1)), 1, A_HALF),
         pad2(jnp.reshape(params["bs"], (1, -1)), 1, A_HALF)], axis=1)      # (1, 384)

    return {"w_slab": w_slab, "b_slab": b_slab,
            "state_space": S, "action_space": A}


def actor_forward(state, noise, packed):
    """ActorNetwork forward pass in one Pallas kernel.

    state: (B, state_space) f32, noise: (B, action_space) f32 standard normal,
    packed: output of pack_params. Returns (action, log_probability), (B, A) each.
    """
    B, S = state.shape
    Bn, A = noise.shape
    assert Bn == B
    assert S == packed["state_space"] and A == packed["action_space"]

    f32 = jnp.float32
    state = state.astype(f32)
    noise = noise.astype(f32)

    tb, b_pad = _choose_tiles(B)
    if b_pad != B:                                    # tiny row-only pad
        state = jnp.pad(state, ((0, b_pad - B), (0, 0)))
        noise = jnp.pad(noise, ((0, b_pad - B), (0, 0)))
    grid = (b_pad // tb,)

    kernel = functools.partial(actor_kernel, s_real=S, a_real=A)

    out = pl.pallas_call(
        kernel,
        out_shape=jax.ShapeDtypeStruct((b_pad, OUT_W), f32),
        grid=grid,
        in_specs=[
            pl.BlockSpec((tb, S), lambda i: (i, 0)),          # unpadded state rows
            pl.BlockSpec((tb, A), lambda i: (i, 0)),          # unpadded noise rows
            pl.BlockSpec((S_PAD, W_COLS), lambda i: (0, 0)),  # weights stay resident
            pl.BlockSpec((1, W_COLS), lambda i: (0, 0)),      # biases stay resident
        ],
        out_specs=pl.BlockSpec((tb, OUT_W), lambda i: (i, 0)),
        scratch_shapes=[pltpu.VMEM((tb, S_PAD), f32),         # lane-padded state
                        pltpu.VMEM((tb, A_HALF), f32)],       # lane-padded noise
        compiler_params=pltpu.CompilerParams(
            dimension_semantics=("parallel",),
            vmem_limit_bytes=48 * 1024 * 1024),
    )(state, noise, packed["w_slab"], packed["b_slab"])

    action = out[:B, :A]
    log_prob = out[:B, A_HALF:A_HALF + A]
    return action, log_prob


def init_params(key, state_space, action_space):
    """Deterministic init mimicking nn.Linear's U(-1/sqrt(fan_in), 1/sqrt(fan_in))."""
    def linear(k, fan_in, fan_out):
        kw, kb = jax.random.split(k)
        bound = 1.0 / math.sqrt(fan_in)
        w = jax.random.uniform(kw, (fan_in, fan_out), jnp.float32, -bound, bound)
        b = jax.random.uniform(kb, (1, fan_out), jnp.float32, -bound, bound)
        return w, b

    k1, k2, k3, k4 = jax.random.split(key, 4)
    w1, b1 = linear(k1, state_space, HIDDEN)
    w2, b2 = linear(k2, HIDDEN, HIDDEN)
    wm, bm = linear(k3, HIDDEN, action_space)
    ws, bs = linear(k4, HIDDEN, action_space)
    return {"w1": w1, "b1": b1, "w2": w2, "b2": b2,
            "wm": wm, "bm": bm, "ws": ws, "bs": bs}


def actor_reference(state, noise, params, matmul_dtype=jnp.bfloat16):
    """Pure-jnp reference with the original (un-simplified) math; matmul inputs
    are cast to the same dtype the kernel feeds the MXU (f32 accumulation)."""
    def mm(a, w):
        return jnp.dot(a.astype(matmul_dtype), jnp.asarray(w).astype(matmul_dtype),
                       preferred_element_type=jnp.float32)

    def leaky(v):
        return jnp.where(v >= 0, v, LEAKY_SLOPE * v)

    h = leaky(mm(state, params["w1"]) + params["b1"])
    h = leaky(mm(h, params["w2"]) + params["b2"])
    mean = mm(h, params["wm"]) + params["bm"]
    log_std = jnp.clip(mm(h, params["ws"]) + params["bs"], LOG_STD_MIN, LOG_STD_MAX)
    std = jnp.exp(log_std)
    sample = mean + std * noise
    x_t = jnp.tanh(sample)
    action = ACTION_SCALE * x_t + ACTION_BIAS
    action = jnp.minimum(jnp.maximum(action, ACTION_MAX), ACTION_MIN)
    var = std * std
    log_prob = -((sample - mean) ** 2) / (2.0 * var) - log_std - LOG_SQRT_2PI
    log_prob = log_prob - jnp.sum(jnp.log(ACTION_SCALE * (1.0 - x_t * x_t) + 1e-6),
                                  axis=-1, keepdims=True)
    return action, log_prob


if __name__ == "__main__":
    key = jax.random.PRNGKey(0)
    k_params, k_state, k_noise = jax.random.split(key, 3)

    B = 8            # batch
    STATE_SPACE = 4  # pendulum observation dim
    ACTION_SPACE = 2

    params = init_params(k_params, STATE_SPACE, ACTION_SPACE)
    packed = pack_params(params)   # packed once, reused for every forward call

    state = jax.random.normal(k_state, (B, STATE_SPACE), jnp.float32)
    noise = jax.random.normal(k_noise, (B, ACTION_SPACE), jnp.float32)

    action, log_prob = actor_forward(state, noise, packed)
    jax.block_until_ready((action, log_prob))

    assert action.shape == (B, ACTION_SPACE)
    assert log_prob.shape == (B, ACTION_SPACE)

    ref_action, ref_log_prob = actor_reference(state, noise, params)
    assert bool(jnp.allclose(action, ref_action, atol=5e-3, rtol=5e-3))
    assert bool(jnp.allclose(log_prob, ref_log_prob, atol=5e-3, rtol=5e-3))

    # exercise the multi-program (2 TensorCore) path with a moderate batch
    B2 = 136
    state2 = jax.random.normal(jax.random.PRNGKey(1), (B2, STATE_SPACE), jnp.float32)
    noise2 = jnp.clip(jax.random.normal(jax.random.PRNGKey(2),
                                        (B2, ACTION_SPACE), jnp.float32), -2.0, 2.0)
    a2, lp2 = actor_forward(state2, noise2, packed)
    jax.block_until_ready((a2, lp2))
    ra2, rlp2 = actor_reference(state2, noise2, params)
    assert bool(jnp.allclose(a2, ra2, atol=2e-2, rtol=2e-2))
    assert bool(jnp.allclose(lp2, rlp2, atol=2e-2, rtol=2e-2))

    print("KERNEL_OK")
</pallas_src>

<mosaic_0001>
module attributes {stable_mosaic.version = 11 : i64} {
  func.func @actor_kernel(%arg0: i32, %arg1: memref<8x4xf32, #tpu.memory_space<vmem>>, %arg2: memref<8x2xf32, #tpu.memory_space<vmem>>, %arg3: memref<128x384xbf16, #tpu.memory_space<vmem>>, %arg4: memref<1x384xf32, #tpu.memory_space<vmem>>, %arg5: memref<8x128xf32, #tpu.memory_space<vmem>>, %arg6: memref<8x128xf32, #tpu.memory_space<vmem>>, %arg7: memref<8x64xf32, #tpu.memory_space<vmem>>) attributes {dimension_semantics = [#tpu.dimension_semantics<parallel>], iteration_bounds = array<i64: 1>, scalar_prefetch = 0 : i64, scratch_operands = 2 : i64, tpu.core_type = #tpu.core_type<tc>, window_params = [{transform_indices = @transform_0, window_bounds = array<i64: 8, 4>}, {transform_indices = @transform_1, window_bounds = array<i64: 8, 2>}, {pipeline_mode = #tpu.pipeline_mode<synchronous>, transform_indices = @transform_2, window_bounds = array<i64: 128, 384>}, {pipeline_mode = #tpu.pipeline_mode<synchronous>, transform_indices = @transform_3, window_bounds = array<i64: 1, 384>}, {transform_indices = @transform_4, window_bounds = array<i64: 8, 128>}]} {
    %cst = arith.constant 0.000000e+00 : f32
    %0 = vector.broadcast %cst : f32 to vector<8x128xf32>
    %c0 = arith.constant 0 : index
    %c0_0 = arith.constant 0 : index
    %1 = vector.load %arg6[%c0, %c0_0] : memref<8x128xf32, #tpu.memory_space<vmem>>, vector<8x128xf32>
    tpu.vector_store %arg6[%c0, %c0_0], %0 {strides = array<i32>} : memref<8x128xf32, #tpu.memory_space<vmem>>, vector<8x128xf32>,
    %cst_1 = arith.constant 0.000000e+00 : f32
    %2 = vector.broadcast %cst_1 : f32 to vector<8x64xf32>
    %c0_2 = arith.constant 0 : index
    %c0_3 = arith.constant 0 : index
    %3 = vector.load %arg7[%c0_2, %c0_3] : memref<8x64xf32, #tpu.memory_space<vmem>>, vector<8x64xf32>
    tpu.vector_store %arg7[%c0_2, %c0_3], %2 {strides = array<i32>} : memref<8x64xf32, #tpu.memory_space<vmem>>, vector<8x64xf32>,
    %c0_4 = arith.constant 0 : index
    %c0_5 = arith.constant 0 : index
    %4 = vector.load %arg1[%c0_4, %c0_5] : memref<8x4xf32, #tpu.memory_space<vmem>>, vector<8x4xf32>
    %c0_6 = arith.constant 0 : index
    %c0_7 = arith.constant 0 : index
    %5 = vector.load %arg6[%c0_6, %c0_7] : memref<8x128xf32, #tpu.memory_space<vmem>>, vector<8x4xf32>
    tpu.vector_store %arg6[%c0_6, %c0_7], %4 {strides = array<i32>} : memref<8x128xf32, #tpu.memory_space<vmem>>, vector<8x4xf32>,
    %c0_8 = arith.constant 0 : index
    %c0_9 = arith.constant 0 : index
    %6 = vector.load %arg2[%c0_8, %c0_9] : memref<8x2xf32, #tpu.memory_space<vmem>>, vector<8x2xf32>
    %c0_10 = arith.constant 0 : index
    %c0_11 = arith.constant 0 : index
    %7 = vector.load %arg7[%c0_10, %c0_11] : memref<8x64xf32, #tpu.memory_space<vmem>>, vector<8x2xf32>
    tpu.vector_store %arg7[%c0_10, %c0_11], %6 {strides = array<i32>} : memref<8x64xf32, #tpu.memory_space<vmem>>, vector<8x2xf32>,
    %c0_12 = arith.constant 0 : index
    %c0_13 = arith.constant 0 : index
    %8 = vector.load %arg6[%c0_12, %c0_13] : memref<8x128xf32, #tpu.memory_space<vmem>>, vector<8x128xf32>
    %c0_14 = arith.constant 0 : index
    %c0_15 = arith.constant 0 : index
    %9 = vector.load %arg7[%c0_14, %c0_15] : memref<8x64xf32, #tpu.memory_space<vmem>>, vector<8x64xf32>
    %c0_16 = arith.constant 0 : index
    %c0_17 = arith.constant 0 : index
    %10 = vector.load %arg3[%c0_16, %c0_17] : memref<128x384xbf16, #tpu.memory_space<vmem>>, vector<128x128xbf16>
    %c0_18 = arith.constant 0 : index
    %c128 = arith.constant 128 : index
    %11 = vector.load %arg3[%c0_18, %c128] : memref<128x384xbf16, #tpu.memory_space<vmem>>, vector<128x128xbf16>
    %c0_19 = arith.constant 0 : index
    %c256 = arith.constant 256 : index
    %12 = vector.load %arg3[%c0_19, %c256] : memref<128x384xbf16, #tpu.memory_space<vmem>>, vector<128x128xbf16>
    %c0_20 = arith.constant 0 : index
    %c0_21 = arith.constant 0 : index
    %13 = vector.load %arg4[%c0_20, %c0_21] : memref<1x384xf32, #tpu.memory_space<vmem>>, vector<1x128xf32>
    %c0_22 = arith.constant 0 : index
    %c128_23 = arith.constant 128 : index
    %14 = vector.load %arg4[%c0_22, %c128_23] : memref<1x384xf32, #tpu.memory_space<vmem>>, vector<1x128xf32>
    %c0_24 = arith.constant 0 : index
    %c256_25 = arith.constant 256 : index
    %15 = vector.load %arg4[%c0_24, %c256_25] : memref<1x384xf32, #tpu.memory_space<vmem>>, vector<1x128xf32>
    %16 = arith.truncf %8 : vector<8x128xf32> to vector<8x128xbf16>
    %cst_26 = arith.constant dense<0.000000e+00> : vector<8x128xf32>
    %17 = tpu.matmul %16, %10, %cst_26 {dimension_numbers = #tpu.dot_dimension_numbers<[1], [0], [0], [1], [0, 0, 1, 1], [], []>} : vector<8x128xbf16>, vector<128x128xbf16>, vector<8x128xf32> -> vector<8x128xf32>
    %18 = vector.broadcast %13 : vector<1x128xf32> to vector<8x128xf32>
    %19 = arith.addf %17, %18 : vector<8x128xf32>
    %cst_27 = arith.constant 0.000000e+00 : f32
    %20 = vector.broadcast %cst_27 : f32 to vector<8x128xf32>
    %21 = arith.cmpf oge, %19, %20 : vector<8x128xf32>
    %cst_28 = arith.constant 0.00999999977 : f32
    %22 = vector.broadcast %cst_28 : f32 to vector<8x128xf32>
    %23 = arith.mulf %22, %19 : vector<8x128xf32>
    %24 = arith.select %21, %19, %23 : vector<8x128xi1>, vector<8x128xf32>
    %25 = arith.truncf %24 : vector<8x128xf32> to vector<8x128xbf16>
    %cst_29 = arith.constant dense<0.000000e+00> : vector<8x128xf32>
    %26 = tpu.matmul %25, %11, %cst_29 {dimension_numbers = #tpu.dot_dimension_numbers<[1], [0], [0], [1], [0, 0, 1, 1], [], []>} : vector<8x128xbf16>, vector<128x128xbf16>, vector<8x128xf32> -> vector<8x128xf32>
    %27 = vector.broadcast %14 : vector<1x128xf32> to vector<8x128xf32>
    %28 = arith.addf %26, %27 : vector<8x128xf32>
    %cst_30 = arith.constant 0.000000e+00 : f32
    %29 = vector.broadcast %cst_30 : f32 to vector<8x128xf32>
    %30 = arith.cmpf oge, %28, %29 : vector<8x128xf32>
    %cst_31 = arith.constant 0.00999999977 : f32
    %31 = vector.broadcast %cst_31 : f32 to vector<8x128xf32>
    %32 = arith.mulf %31, %28 : vector<8x128xf32>
    %33 = arith.select %30, %28, %32 : vector<8x128xi1>, vector<8x128xf32>
    %34 = arith.truncf %33 : vector<8x128xf32> to vector<8x128xbf16>
    %cst_32 = arith.constant dense<0.000000e+00> : vector<8x128xf32>
    %35 = tpu.matmul %34, %12, %cst_32 {dimension_numbers = #tpu.dot_dimension_numbers<[1], [0], [0], [1], [0, 0, 1, 1], [], []>} : vector<8x128xbf16>, vector<128x128xbf16>, vector<8x128xf32> -> vector<8x128xf32>
    %36 = vector.broadcast %15 : vector<1x128xf32> to vector<8x128xf32>
    %37 = arith.addf %35, %36 : vector<8x128xf32>
    %38 = vector.extract_strided_slice %37 {offsets = [0, 0], sizes = [8, 64], strides = [1, 1]} : vector<8x128xf32> to vector<8x64xf32>
    %39 = vector.extract_strided_slice %37 {offsets = [0, 64], sizes = [8, 64], strides = [1, 1]} : vector<8x128xf32> to vector<8x64xf32>
    %cst_33 = arith.constant -2.000000e+01 : f32
    %cst_34 = arith.constant 2.000000e+00 : f32
    %40 = vector.broadcast %cst_33 : f32 to vector<8x64xf32>
    %41 = arith.maximumf %40, %39 : vector<8x64xf32>
    %42 = vector.broadcast %cst_34 : f32 to vector<8x64xf32>
    %43 = arith.minimumf %42, %41 : vector<8x64xf32>
    %44 = math.exp %43 : vector<8x64xf32>
    %45 = arith.mulf %44, %9 : vector<8x64xf32>
    %46 = arith.addf %38, %45 : vector<8x64xf32>
    %47 = math.tanh %46 : vector<8x64xf32>
    %cst_35 = arith.constant 1.000000e+00 : f32
    %48 = vector.broadcast %cst_35 : f32 to vector<8x64xf32>
    %49 = arith.mulf %48, %47 : vector<8x64xf32>
    %cst_36 = arith.constant 0.000000e+00 : f32
    %50 = vector.broadcast %cst_36 : f32 to vector<8x64xf32>
    %51 = arith.addf %49, %50 : vector<8x64xf32>
    %cst_37 = arith.constant 1.000000e+00 : f32
    %52 = vector.broadcast %cst_37 : f32 to vector<8x64xf32>
    %53 = arith.maximumf %51, %52 : vector<8x64xf32>
    %cst_38 = arith.constant -1.000000e+00 : f32
    %54 = vector.broadcast %cst_38 : f32 to vector<8x64xf32>
    %55 = arith.minimumf %53, %54 : vector<8x64xf32>
    %56 = arith.mulf %9, %9 : vector<8x64xf32>
    %cst_39 = arith.constant -5.000000e-01 : f32
    %57 = vector.broadcast %cst_39 : f32 to vector<8x64xf32>
    %58 = arith.mulf %57, %56 : vector<8x64xf32>
    %59 = arith.subf %58, %43 : vector<8x64xf32>
    %cst_40 = arith.constant 0.918938517 : f32
    %60 = vector.broadcast %cst_40 : f32 to vector<8x64xf32>
    %61 = arith.subf %59, %60 : vector<8x64xf32>
    %62 = arith.mulf %47, %47 : vector<8x64xf32>
    %cst_41 = arith.constant 1.000000e+00 : f32
    %63 = vector.broadcast %cst_41 : f32 to vector<8x64xf32>
    %64 = arith.subf %63, %62 : vector<8x64xf32>
    %cst_42 = arith.constant 1.000000e+00 : f32
    %65 = vector.broadcast %cst_42 : f32 to vector<8x64xf32>
    %66 = arith.mulf %65, %64 : vector<8x64xf32>
    %cst_43 = arith.constant 9.99999997E-7 : f32
    %67 = vector.broadcast %cst_43 : f32 to vector<8x64xf32>
    %68 = arith.addf %66, %67 : vector<8x64xf32>
    %69 = math.log %68 : vector<8x64xf32>
    %cst_44 = arith.constant dense<0.000000e+00> : vector<8xf32>
    %70 = vector.multi_reduction <add>, %69, %cst_44 [1] : vector<8x64xf32> to vector<8xf32>
    %71 = vector.shape_cast %70 : vector<8xf32> to vector<8x1xf32>
    %cst_45 = arith.constant 6.19999701E-5 : f32
    %72 = vector.broadcast %cst_45 : f32 to vector<8x1xf32>
    %73 = arith.subf %71, %72 : vector<8x1xf32>
    %74 = vector.broadcast %73 : vector<8x1xf32> to vector<8x64xf32>
    %75 = arith.subf %61, %74 : vector<8x64xf32>
    %76 = tpu.concatenate %55, %75 in 1 : vector<8x64xf32>, vector<8x64xf32> -> vector<8x128xf32>
    %c0_46 = arith.constant 0 : index
    %c0_47 = arith.constant 0 : index
    %77 = vector.load %arg5[%c0_46, %c0_47] : memref<8x128xf32, #tpu.memory_space<vmem>>, vector<8x128xf32>
    tpu.vector_store %arg5[%c0_46, %c0_47], %76 {strides = array<i32>} : memref<8x128xf32, #tpu.memory_space<vmem>>, vector<8x128xf32>,
    return
  }
  func.func @transform_0(%arg0: i32) -> (i32, i32) {
    %c0_i32 = arith.constant 0 : i32
    %c0_i32_0 = arith.constant 0 : i32
    return %arg0, %c0_i32 : i32, i32
  }
  func.func @transform_1(%arg0: i32) -> (i32, i32) {
    %c0_i32 = arith.constant 0 : i32
    %c0_i32_0 = arith.constant 0 : i32
    return %arg0, %c0_i32 : i32, i32
  }
  func.func @transform_2(%arg0: i32) -> (i32, i32) {
    %c0_i32 = arith.constant 0 : i32
    %c0_i32_0 = arith.constant 0 : i32
    %c0_i32_1 = arith.constant 0 : i32
    return %c0_i32, %c0_i32_0 : i32, i32
  }
  func.func @transform_3(%arg0: i32) -> (i32, i32) {
    %c0_i32 = arith.constant 0 : i32
    %c0_i32_0 = arith.constant 0 : i32
    %c0_i32_1 = arith.constant 0 : i32
    return %c0_i32, %c0_i32_0 : i32, i32
  }
  func.func @transform_4(%arg0: i32) -> (i32, i32) {
    %c0_i32 = arith.constant 0 : i32
    %c0_i32_0 = arith.constant 0 : i32
    return %arg0, %c0_i32 : i32, i32
  }
}

</mosaic_0001>

<bundles_post_ra>
// kernel: tpu_custom_call.1
= control target key start
LH: loop header
LB: loop body
LE: loop exit
PB: predicated region body
PF: predicated region fallthrough
CT: control target
= control target key end

     0   :  { %9 = vsyncpa [#allocation5], 0  ;;  %s606_s0 = inlined_call_operand.vmem [shape: f32[8,4], index: 0, kind: input, shape index: {}]   ;;  %s607_s1 = inlined_call_operand.vmem [shape: f32[8,2], index: 1, kind: input, shape index: {}]   ;;  %s608_s2 = inlined_call_operand.hbm [shape: bf16[128,384], index: 2, kind: input, shape index: {}]   ;;  %s609_s3 = inlined_call_operand.vmem [shape: f32[1,384], index: 3, kind: input, shape index: {}]   ;;  %s610_s4 = inlined_call_operand.hbm [shape: f32[8,128], index: 4, kind: output, shape index: {}]  }
   0x1   :  { %10 = vsyncpa [#allocation6], 0  ;;  %s19_s17 = sshll.u32 %s608_s2, 4  ;;  %s545_s18 = smov [#allocation4]   ;;  %s20_s17 = int_to_ptr.hbm [resolvable:$true] %s19_s17 }
   0x2   :  { %s21_s19 = sshll.u32 %s545_s18, 4  ;;  %s546_s20 = smov 192   ;;  %s22_s19 = int_to_ptr.vmem [resolvable:$true] %s21_s19 }
   0x3   :  { %s547_s21 = smov 12  }
   0x4   :  { %27 = dma.hbm_to_vmem [thread:$0]  %s20_s17, 3072, %s22_s19, [#allocation5], %s546_s20, %s546_s20, %s547_s21  }
   0x5   :  { %541 = dma.done.wait [#allocation5], 3072  }
   0x6   :  { %542 = vsyncadd [#allocation5], 4294964224  ;;  %v548_v0 = vmov 0.0   ;;  %v386_v1 = vld [vmem:[#allocation4 + $0xa8] sm:$0xf]  ;;  %vm38_vm0 = vcmask 31744  }
   0x7   :  { %34 = vst [vmem:[#allocation2] sm:$0xff] %v548_v0  ;;  %v461_v2 = vld [vmem:[#allocation4 + $0xb0] sm:$0xf0]  ;;  %v382_v3 = vld [vmem:[#allocation4 + $0x90] sm:$0xf]  ;;  %vm35_vm2 = vcmask 523264  }
   0x8   :  { %v387_v4 = vor.u32 %v461_v2, %v386_v1  ;;  %v460_v5 = vld [vmem:[#allocation4 + $0x98] sm:$0xf0]  ;;  %v378_v7 = vld [vmem:[#allocation4 + $0x78] sm:$0xf]  ;;  %v459_v8 = vld [vmem:[#allocation4 + $0x80] sm:$0xf0] }
   0x9   :  { %v383_v6 = vor.u32 %v460_v5, %v382_v3  ;;  %v37_v9 = vld [vmem:[%s606_s0] sm:$0xff]  ;;  %v418_v10 = vld [vmem:[#allocation4 + $0xac] sm:$0xf]  ;;  %v469_v11 = vld [vmem:[#allocation4 + $0xb4] sm:$0xf0]  ;;  %v379_v13 = vor.u32 %v459_v8, %v378_v7  ;;  %vm41_vm3 = vcmask 15360  }
   0xa   :  { %148 = vmatpush.bf16.msra.mxu0 %v387_v4  ;;  %39 = vst.msk [vmem:[#allocation2] sm:$0xff] %vm38_vm0, %v37_v9  ;;  %v414_v12 = vld [vmem:[#allocation4 + $0x94] sm:$0xf]  ;;  %v419_v14 = vor.u32 %v469_v11, %v418_v10  ;;  %v468_v15 = vld [vmem:[#allocation4 + $0x9c] sm:$0xf0]  ;;  %s549_s26 = smov 64  }
   0xb   :  { %v374_v16 = vld [vmem:[#allocation4 + $0x60] sm:$0xf]  ;;  %v458_v17 = vld [vmem:[#allocation4 + $0x68] sm:$0xf0]  ;;  %v415_v18 = vor.u32 %v468_v15, %v414_v12  ;;  %v410_v19 = vld [vmem:[#allocation4 + $0x7c] sm:$0xf] }
   0xc   :  { %216 = vmatpush.bf16.msra.mxu1 %v419_v14  ;;  %v467_v20 = vld [vmem:[#allocation4 + $0x84] sm:$0xf0]  ;;  %v375_v21 = vor.u32 %v458_v17, %v374_v16  ;;  %v457_v23 = vld [vmem:[#allocation4 + $0x50] sm:$0xf0]  ;;  %v406_v25 = vld [vmem:[#allocation4 + $0x64] sm:$0xf] }
   0xd   :  { %v370_v22 = vld [vmem:[#allocation4 + $0x48] sm:$0xf]  ;;  %v411_v24 = vor.u32 %v467_v20, %v410_v19  ;;  %v466_v26 = vld [vmem:[#allocation4 + $0x6c] sm:$0xf0]  ;;  %v456_v29 = vld [vmem:[#allocation4 + $0x38] sm:$0xf0] }
   0xe   :  { %149 = vmatpush.bf16.msra.mxu0 %v383_v6  ;;  %v371_v27 = vor.u32 %v457_v23, %v370_v22  ;;  %v366_v28 = vld [vmem:[#allocation4 + $0x30] sm:$0xf]  ;;  %v407_v30 = vor.u32 %v466_v26, %v406_v25  ;;  %v402_v31 = vld [vmem:[#allocation4 + $0x4c] sm:$0xf]  ;;  %v465_v32 = vld [vmem:[#allocation4 + $0x54] sm:$0xf0] }
   0xf   :  { %v367_v33 = vor.u32 %v456_v29, %v366_v28  ;;  %v362_v34 = vld [vmem:[#allocation4 + $0x18] sm:$0xf]  ;;  %v455_v35 = vld [vmem:[#allocation4 + $0x20] sm:$0xf0]  ;;  %v403_v36 = vor.u32 %v465_v32, %v402_v31  ;;  %v398_v37 = vld [vmem:[#allocation4 + $0x34] sm:$0xf] }
  0x10   :  { %217 = vmatpush.bf16.msra.mxu1 %v415_v18  ;;  %v464_v38 = vld [vmem:[#allocation4 + $0x3c] sm:$0xf0]  ;;  %v363_v39 = vor.u32 %v455_v35, %v362_v34  ;;  %v454_v41 = vld [vmem:[#allocation4 + $0x8] sm:$0xf0]  ;;  %v394_v46 = vld [vmem:[#allocation4 + $0x1c] sm:$0xf] }
  0x11   :  { %v358_v40 = vld [vmem:[#allocation4] sm:$0xf]  ;;  %v399_v42 = vor.u32 %v464_v38, %v398_v37  ;;  %v43_v44 = vld [vmem:[#allocation2] sm:$0xff]  ;;  %v463_v47 = vld [vmem:[#allocation4 + $0x24] sm:$0xf0]  ;;  %36 = vst.msk [vmem:[#allocation3] sm:$0xff] %vm35_vm2, %v548_v0 }
  0x12   :  { %150 = vmatpush.bf16.msra.mxu0 %v379_v13  ;;  %v359_v43 = vor.u32 %v454_v41, %v358_v40  ;;  %v96_v45 = vpack.c.bf16 %v43_v44, %v43_v44  ;;  %v395_v48 = vor.u32 %v463_v47, %v394_v46  ;;  %v390_v49 = vld [vmem:[#allocation4 + $0x4] sm:$0xf]  ;;  %v462_v50 = vld [vmem:[#allocation4 + $0xc] sm:$0xf0]  ;;  %v477_v53 = vld [vmem:[#allocation4 + $0xb8] sm:$0xf0] }
  0x13   :  { %v391_v51 = vor.u32 %v462_v50, %v390_v49  ;;  %v450_v52 = vld [vmem:[#allocation4 + $0xb0] sm:$0xf]  ;;  %v446_v54 = vld [vmem:[#allocation4 + $0x98] sm:$0xf]  ;;  %v476_v56 = vld [vmem:[#allocation4 + $0xa0] sm:$0xf0] }
  0x14   :  { %218 = vmatpush.bf16.msra.mxu1 %v411_v24  ;;  %v451_v55 = vor.u32 %v477_v53, %v450_v52  ;;  %v447_v57 = vor.u32 %v476_v56, %v446_v54  ;;  %v442_v58 = vld [vmem:[#allocation4 + $0x80] sm:$0xf]  ;;  %v475_v59 = vld [vmem:[#allocation4 + $0x88] sm:$0xf0]  ;;  %v438_v61 = vld [vmem:[#allocation4 + $0x68] sm:$0xf] }
  0x15   :  { %v443_v60 = vor.u32 %v475_v59, %v442_v58  ;;  %v474_v62 = vld [vmem:[#allocation4 + $0x70] sm:$0xf0]  ;;  %v434_v1 = vld [vmem:[#allocation4 + $0x50] sm:$0xf]  ;;  %v473_v2 = vld [vmem:[#allocation4 + $0x58] sm:$0xf0] }
  0x16   :  { %151 = vmatpush.bf16.msra.mxu0 %v375_v21  ;;  %284 = vmatpush.bf16.msra.mxu2 %v451_v55  ;;  %v439_v63 = vor.u32 %v474_v62, %v438_v61  ;;  %v435_v3 = vor.u32 %v473_v2, %v434_v1  ;;  %v430_v4 = vld [vmem:[#allocation4 + $0x38] sm:$0xf]  ;;  %v472_v5 = vld [vmem:[#allocation4 + $0x40] sm:$0xf0]  ;;  %v484_v7 = vld [vmem:[%s609_s3] ss:$0 sm:$0xff] }
  0x17   :  { %v431_v6 = vor.u32 %v472_v5, %v430_v4  ;;  %v426_v14 = vld [vmem:[#allocation4 + $0x20] sm:$0xf]  ;;  %v471_v15 = vld [vmem:[#allocation4 + $0x28] sm:$0xf0]  ;;  %v422_v17 = vld [vmem:[#allocation4 + $0x8] sm:$0xf] }
  0x18   :  { %219 = vmatpush.bf16.msra.mxu1 %v407_v30  ;;  %v427_v16 = vor.u32 %v471_v15, %v426_v14  ;;  %v470_v18 = vld [vmem:[#allocation4 + $0x10] sm:$0xf0]  ;;  %v485_v22 = vld [vmem:[%s609_s3 + $0x1] ss:$0 sm:$0xff]  ;;  %v486_v0 = vld [vmem:[%s609_s3 + $0x2] ss:$0 sm:$0xff] }
  0x19   :  { %v423_v19 = vor.u32 %v470_v18, %v422_v17  ;;  %v40_v20 = vld [vmem:[%s607_s1] sm:$0xff]  ;;  %s550_s3 = smov [#allocation7]   ;;  %s346_s7 = sshll.u32 %s610_s4, 4  ;;  %s347_s7 = int_to_ptr.hbm [resolvable:$true] %s346_s7 }
  0x1a   :  { %152 = vmatpush.bf16.msra.mxu0 %v371_v27  ;;  %285 = vmatpush.bf16.msra.mxu2 %v447_v57  ;;  %42 = vst.msk [vmem:[#allocation3] sm:$0xff] %vm41_vm3, %v40_v20  ;;  %s344_s30 = sshll.u32 %s550_s3, 4  ;;  %s345_s30 = int_to_ptr.vmem [resolvable:$true] %s344_s30 }
  0x1c   :  { %220 = vmatpush.bf16.msra.mxu1 %v403_v36 }
  0x1e   :  { %153 = vmatpush.bf16.msra.mxu0 %v367_v33  ;;  %286 = vmatpush.bf16.msra.mxu2 %v443_v60 }
  0x20   :  { %221 = vmatpush.bf16.msra.mxu1 %v399_v42 }
  0x21   :  { %v44_v21 = vld [vmem:[#allocation3] sm:$0xff] }
  0x22   :  { %154 = vmatpush.bf16.msra.mxu0 %v363_v39  ;;  %287 = vmatpush.bf16.msra.mxu2 %v439_v63  ;;  %v315_v47 = vmul.f32 %v44_v21, %v44_v21 }
  0x23   :  { %302 = vrot.lane.b32.xlu0 %v44_v21, %s549_s26 }
  0x24   :  { %222 = vmatpush.bf16.msra.mxu1 %v395_v48  ;;  %v316_v49 = vmul.f32 -0.5, %v315_v47 }
  0x26   :  { %155 = vmatpush.bf16.msra.mxu0 %v359_v43  ;;  %288 = vmatpush.bf16.msra.mxu2 %v435_v3 }
  0x28   :  { %223 = vmatpush.bf16.msra.mxu1 %v391_v51 }
  0x29   :  { %156 = vmatmul.bf16.vlgmr.msra.gmra.mxu0 %v96_v45 }
  0x2a   :  { %289 = vmatpush.bf16.msra.mxu2 %v431_v6 }
  0x2e   :  { %290 = vmatpush.bf16.msra.mxu2 %v427_v16 }
  0x32   :  { %291 = vmatpush.bf16.msra.mxu2 %v423_v19 }
  0x95   :  { %v303_v35 = vpop.permute.xlu0 %302 }
  0xa6   :  { %v157_v8 = vpop.f32.mrf.mxu0 }
  0xa7   :  { %v158_v9 = vadd.f32 %v484_v7, %v157_v8 }
  0xa9   :  { %v162_v10 = vmul.f32 0.01, %v158_v9  ;;  %vm161_vm1 = vcmp.ge.f32.partialorder %v158_v9, 0.0 }
  0xab   :  { %v163_v11 = vsel %vm161_vm1, %v158_v9, %v162_v10 }
  0xac   :  { %v164_v12 = vpack.c.bf16 %v163_v11, %v163_v11 }
  0xae   :  { %v159_v13 = vpop.f32.mrf.mxu0  ;;  %224 = vmatmul.bf16.vlgmr.msra.gmra.mxu1 %v164_v12 }
 0x12b   :  { %v225_v23 = vpop.f32.mrf.mxu1 }
 0x12c   :  { %v226_v24 = vadd.f32 %v485_v22, %v225_v23 }
 0x12e   :  { %v230_v25 = vmul.f32 0.01, %v226_v24  ;;  %vm229_vm4 = vcmp.ge.f32.partialorder %v226_v24, 0.0 }
 0x130   :  { %v231_v26 = vsel %vm229_vm4, %v226_v24, %v230_v25 }
 0x131   :  { %v232_v27 = vpack.c.bf16 %v231_v26, %v231_v26 }
 0x133   :  { %v227_v28 = vpop.f32.mrf.mxu1  ;;  %292 = vmatmul.bf16.vlgmr.msra.gmra.mxu2 %v232_v27 }
 0x1b6   :  { %v293_v29 = vpop.f32.mrf.mxu2 }
 0x1b7   :  { %v294_v30 = vadd.f32 %v486_v0, %v293_v29 }
 0x1b9   :  { %v297_v31 = vmax.f32 %v294_v30, -20.0 }
 0x1bb   :  { %v298_v32 = vmin.f32 %v297_v31, 2.0 }
 0x1bd   :  { %318 = vrot.lane.b32.xlu1 %v298_v32, %s549_s26  ;;  %v299_v33 = vmul.f32 1.442695, %v298_v32 }
 0x1be   :  { %v295_v34 = vpop.f32.mrf.mxu2 }
 0x1bf   :  { %487 = vpow2.f32 %v299_v33 }
 0x1c5   :  { %v488_v36 = vpop.eup %487 }
 0x1c6   :  { %v305_v37 = vmul.f32 %v488_v36, %v303_v35 }
 0x1c8   :  { %307 = vrot.lane.b32.xlu0 %v305_v37, %s549_s26 }
 0x22f   :  { %v319_v48 = vpop.permute.xlu1 %318 }
 0x230   :  { %v321_v50 = vsub.f32 %v316_v49, %v319_v48 }
 0x232   :  { %v452_v52 = vadd.f32 -0.9189385, %v321_v50 }
 0x23a   :  { %v308_v38 = vpop.permute.xlu0 %307 }
 0x23b   :  { %v310_v39 = vadd.f32 %v308_v38, %v294_v30 }
 0x23d   :  { %489 = vtanh.f32 %v310_v39 }
 0x243   :  { %v490_v40 = vpop.eup %489 }
 0x244   :  { %v323_v41 = vmul.f32 %v490_v40, %v490_v40  ;;  %v313_v55 = vmax.f32 %v490_v40, 1.0 }
 0x246   :  { %v324_v42 = vsub.f32 1.0, %v323_v41  ;;  %v314_v56 = vmin.f32 %v313_v55, -1.0 }
 0x248   :  { %v325_v43 = vadd.f32 1e-06, %v324_v42 }
 0x24a   :  { %491 = vlog2.f32 %v325_v43 }
 0x250   :  { %v492_v44 = vpop.eup %491 }
 0x251   :  { %v327_v45 = vmul.f32 0.6931472, %v492_v44 }
 0x253   :  { %v328_v46 = vsel %vm35_vm2, %v327_v45, 0.0 }
 0x254   :  { %329 = vadd.xlane.f32.xlu1 %v328_v46 }
 0x2c7   :  { %v330_v51 = vpop.xlane.xlu1 %329 }
 0x2c8   :  { %v453_v53 = vadd.f32 -6.199997e-05, %v330_v51 }
 0x2ca   :  { %v332_v54 = vsub.f32 %v452_v52, %v453_v53 }
 0x2cc   :  { %334 = vrot.lane.b32.xlu2 %v332_v54, %s549_s26 }
 0x326   :  { %v335_v57 = vpop.permute.xlu2 %334 }
 0x327   :  { %v337_v58 = vsel %vm35_vm2, %v314_v56, %v335_v57 }
 0x328   :  { %338 = vst [vmem:[#allocation7] sm:$0xff] %v337_v58 }
 0x329   :  { %349 = dma.vmem_to_hbm [thread:$0]  %s345_s30, 128, %s347_s7, [#allocation6]  }
 0x32a   :  { %543 = dma.done.wait [#allocation6], 128  }
 0x32b   :  { %544 = vsyncadd [#allocation6], 4294967168 }
 0x32c   :  { %354 = vsyncpa [#allocation5], 1 }
 0x32d   :  { %355 = vsyncpa [#allocation6], 1 }

</bundles_post_ra>
